<compile_context>
chip_gen: v7x
topology: tpu7x:2x2x1
jax: 0.10.0
libtpu: 0.0.40
codegen_flags: <defaults>
</compile_context>

<pallas_src>
import math

import jax
import jax.numpy as jnp
from jax.experimental import pallas as pl
from jax.experimental.pallas import tpu as pltpu


def _make_hbm_copy_kernel(num_chunks, chunk_rows, rows):
    """Build a kernel doing a chunked HBM->HBM identity copy.

    The chunk schedule is static (shapes are known at trace time), so the
    loop is a small, fully-unrolled Python loop with static `pl.ds` starts.
    At most two DMAs are in flight at any time (semaphore slots 0/1).
    """

    def kernel(x_hbm, o_hbm, sems):
        def copy_for(c):
            start = c * chunk_rows
            size = min(chunk_rows, rows - start)
            return pltpu.make_async_copy(
                x_hbm.at[pl.ds(start, size), :],
                o_hbm.at[pl.ds(start, size), :],
                sems.at[c % 2],
            )

        # Prime the pipeline: chunk 0 in flight.
        copy_for(0).start()
        for c in range(num_chunks):
            if c + 1 < num_chunks:
                copy_for(c + 1).start()   # keep a second DMA in flight
            copy_for(c).wait()

    return kernel


def _pallas_identity_copy(x, *, chunk_bytes=8 * 1024 * 1024, max_chunks=64):
    """Identity copy of `x` via chunked HBM->HBM DMA (no VMEM staging)."""
    orig_shape = x.shape
    if x.ndim == 0:
        x2 = x.reshape(1, 1)
    elif x.ndim == 1:
        x2 = x.reshape(1, orig_shape[0])
    else:
        x2 = x.reshape(math.prod(orig_shape[:-1]), orig_shape[-1])
    rows, hidden = x2.shape

    itemsize = jnp.dtype(x2.dtype).itemsize
    row_bytes = max(1, hidden * itemsize)
    # Keep chunk row counts sublane-aligned when possible (8 rows for f32,
    # 16 for bf16, 32 for int8) so DMA descriptors stay tile-friendly.
    sublane = max(8, 32 // itemsize)

    chunk_rows = max(1, chunk_bytes // row_bytes)
    if rows >= sublane:
        chunk_rows = max(sublane, (chunk_rows // sublane) * sublane)
    chunk_rows = min(chunk_rows, rows)
    num_chunks = int(pl.cdiv(rows, chunk_rows))
    if num_chunks > max_chunks:
        # Bound the unrolled loop length for very large inputs.
        chunk_rows = int(pl.cdiv(rows, max_chunks))
        if rows >= sublane:
            chunk_rows = ((chunk_rows + sublane - 1) // sublane) * sublane
        num_chunks = int(pl.cdiv(rows, chunk_rows))

    kernel = _make_hbm_copy_kernel(num_chunks, int(chunk_rows), rows)

    out2 = pl.pallas_call(
        kernel,
        out_shape=jax.ShapeDtypeStruct((rows, hidden), x2.dtype),
        in_specs=[pl.BlockSpec(memory_space=pl.ANY)],
        out_specs=pl.BlockSpec(memory_space=pl.ANY),
        scratch_shapes=[pltpu.SemaphoreType.DMA((2,))],
        cost_estimate=pl.CostEstimate(
            flops=0,
            transcendentals=0,
            bytes_accessed=2 * rows * hidden * itemsize,
        ),
    )(x2)
    return out2.reshape(orig_shape)


def sequence_generator_forward(*inputs, use_pallas_copy=False,
                               chunk_bytes=8 * 1024 * 1024):
    """Pallas implementation of SequenceGenerator.forward(*inputs).

    The reference forward body is `pass` (no compute).  We return inputs[0]
    unchanged.  The default path is a zero-cost pass-through; set
    `use_pallas_copy=True` to route the data through a chunked HBM->HBM DMA
    copy kernel (e.g. when an explicit custom-call boundary is required).
    """
    x = inputs[0]
    if not use_pallas_copy:
        # Identity forward: do not spend HBM bandwidth on a memcpy.
        return x
    return _pallas_identity_copy(x, chunk_bytes=chunk_bytes)


if __name__ == "__main__":
    key = jax.random.PRNGKey(0)
    batch, seq, hidden = 2, 8, 128
    # Deterministic example "sequence features" input.
    x = jax.random.normal(key, (batch, seq, hidden), dtype=jnp.float32)

    # Fast path (preferred): zero-cost pass-through.
    out_fast = sequence_generator_forward(x)
    out_fast = jax.block_until_ready(out_fast)
    assert out_fast.shape == x.shape
    assert out_fast.dtype == x.dtype
    assert bool(jnp.allclose(out_fast, x))

    # Pallas path, single-chunk DMA (default 8 MiB chunking, 16x128 f32 fits
    # in one chunk).
    out_copy1 = sequence_generator_forward(x, use_pallas_copy=True)
    out_copy1 = jax.block_until_ready(out_copy1)
    assert out_copy1.shape == x.shape
    assert out_copy1.dtype == x.dtype
    assert bool(jnp.allclose(out_copy1, x))

    # Pallas path, forced multi-chunk (4 KiB chunks -> 2 chunks) to exercise
    # the double-buffered two-DMAs-in-flight schedule.
    out_copy2 = sequence_generator_forward(x, use_pallas_copy=True,
                                           chunk_bytes=4096)
    out_copy2 = jax.block_until_ready(out_copy2)
    assert out_copy2.shape == x.shape
    assert out_copy2.dtype == x.dtype
    assert bool(jnp.allclose(out_copy2, x))

    print("KERNEL_OK")
</pallas_src>

<mosaic_0001>
module attributes {stable_mosaic.version = 11 : i64} {
  func.func @kernel(%arg0: memref<16x128xf32, #tpu.memory_space<any>>, %arg1: memref<16x128xf32, #tpu.memory_space<any>>, %arg2: memref<2x!tpu.dma_semaphore, #tpu.memory_space<semaphore_mem>>) attributes {dimension_semantics = [], scalar_prefetch = 0 : i64, scratch_operands = 1 : i64, tpu.core_type = #tpu.core_type<tc>} {
    %c0_i32 = arith.constant 0 : i32
    %c0_i32_0 = arith.constant 0 : i32
    %c0_i32_1 = arith.constant 0 : i32
    %0 = tpu.memref_slice %arg0[%c0_i32_0, %c0_i32_1] : memref<16x128xf32, #tpu.memory_space<any>> -> memref<16x128xf32, #tpu.memory_space<any>>
    %c0_i32_2 = arith.constant 0 : i32
    %c0_i32_3 = arith.constant 0 : i32
    %1 = tpu.memref_slice %arg1[%c0_i32_2, %c0_i32_3] : memref<16x128xf32, #tpu.memory_space<any>> -> memref<16x128xf32, #tpu.memory_space<any>>
    %2 = tpu.memref_slice %arg2[%c0_i32] : memref<2x!tpu.dma_semaphore, #tpu.memory_space<semaphore_mem>> -> memref<1x!tpu.dma_semaphore, #tpu.memory_space<semaphore_mem>>
    %3 = tpu.memref_squeeze %2 : memref<1x!tpu.dma_semaphore, #tpu.memory_space<semaphore_mem>> -> memref<!tpu.dma_semaphore, #tpu.memory_space<semaphore_mem>>
    tpu.enqueue_dma source(%0 : memref<16x128xf32, #tpu.memory_space<any>>) target(%1 : memref<16x128xf32, #tpu.memory_space<any>>) target_semaphore(%3 : memref<!tpu.dma_semaphore, #tpu.memory_space<semaphore_mem>>)
    %c0_i32_4 = arith.constant 0 : i32
    %c0_i32_5 = arith.constant 0 : i32
    %c0_i32_6 = arith.constant 0 : i32
    %4 = tpu.memref_slice %arg0[%c0_i32_5, %c0_i32_6] : memref<16x128xf32, #tpu.memory_space<any>> -> memref<16x128xf32, #tpu.memory_space<any>>
    %c0_i32_7 = arith.constant 0 : i32
    %c0_i32_8 = arith.constant 0 : i32
    %5 = tpu.memref_slice %arg1[%c0_i32_7, %c0_i32_8] : memref<16x128xf32, #tpu.memory_space<any>> -> memref<16x128xf32, #tpu.memory_space<any>>
    %6 = tpu.memref_slice %arg2[%c0_i32_4] : memref<2x!tpu.dma_semaphore, #tpu.memory_space<semaphore_mem>> -> memref<1x!tpu.dma_semaphore, #tpu.memory_space<semaphore_mem>>
    %7 = tpu.memref_squeeze %6 : memref<1x!tpu.dma_semaphore, #tpu.memory_space<semaphore_mem>> -> memref<!tpu.dma_semaphore, #tpu.memory_space<semaphore_mem>>
    tpu.wait_dma2 semaphore(%7 : memref<!tpu.dma_semaphore, #tpu.memory_space<semaphore_mem>>) src(%4 : memref<16x128xf32, #tpu.memory_space<any>>) dst(%5 : memref<16x128xf32, #tpu.memory_space<any>>)
    return
  }
}

</mosaic_0001>

<bundles_post_ra>
// kernel: tpu_custom_call.1
= control target key start
LH: loop header
LB: loop body
LE: loop exit
PB: predicated region body
PF: predicated region fallthrough
CT: control target
= control target key end

     0   :  { %s42_s6 = smov [#allocation2]   ;;  %s43_s7 = smov [#allocation3]   ;;  %s61_s0 = inlined_call_operand.hbm [shape: f32[16,128], index: 0, kind: input, shape index: {}]   ;;  %s62_s1 = inlined_call_operand.hbm [shape: f32[16,128], index: 1, kind: output, shape index: {}]  }
   0x1   :  { %s44_s8 = smov 0  }
   0x2   :  { %18 = dma.general %s61_s0, 256, %s62_s1, %s42_s6, %s43_s7, [#allocation4], %s44_s8, 0  }
   0x3   :  { %40 = dma.done.wait [#allocation2], 256 }
   0x4   :  { %41 = vsyncadd [#allocation2], 4294967040 }
   0x5   :  { %22 = vsyncmov [#allocation2] }
   0x8   :  { %s23_s13 = vpop.sfrf %22 }
   0x9   :  { %p35_p0 = scmp.ne.s32.totalorder %s23_s13, 0 }
   0xb   :  { %27 = shalt.err (%p35_p0)  }
   0xc   :  { %29 = vsyncmov [#allocation2 + $0x1] }
   0xf   :  { %s30_s14 = vpop.sfrf %29 }
  0x10   :  { %p36_p1 = scmp.ne.s32.totalorder %s30_s14, 0 }
  0x12   :  { %34 = shalt.err (%p36_p1)  }

</bundles_post_ra>
